<compile_context>
chip_gen: v5e
topology: v5e:2x2
jax: 0.10.0
libtpu: 0.0.40
codegen_flags: <defaults>
</compile_context>

<pallas_src>
import jax
import jax.numpy as jnp
from jax.experimental import pallas as pl
from jax.experimental.pallas import tpu as pltpu


def _lr_kernel(w_ref, x_ref, o_ref):
    # w_ref: (2,)            f32 in SMEM  (scalar reads)
    # x_ref: (2, R, LANES)   f32 in VMEM  (dense per-feature slabs)
    # o_ref: (R, LANES)      f32 in VMEM  (dense output slab)
    z = w_ref[0] * x_ref[0] + w_ref[1] * x_ref[1]          # VPU multiply-adds
    o_ref[...] = 1.0 / (1.0 + jnp.exp(-z))                 # exp on the EUP


def _lr_pallas_slab(xs: jax.Array, w: jax.Array, block_rows: int) -> jax.Array:
    """Run the kernel on an already-dense slab xs of shape (2, M, LANES).

    M must be a multiple of `block_rows` (itself a multiple of 8).
    Returns the dense (M, LANES) output slab.
    """
    f, m, lanes = xs.shape
    n = m * lanes
    grid = (m // block_rows,)
    return pl.pallas_call(
        _lr_kernel,
        out_shape=jax.ShapeDtypeStruct((m, lanes), jnp.float32),
        grid=grid,
        in_specs=[
            pl.BlockSpec(memory_space=pltpu.MemorySpace.SMEM),          # weights (2,) as scalars
            pl.BlockSpec((f, block_rows, lanes), lambda i: (0, i, 0)),  # dense input slab tile
        ],
        out_specs=pl.BlockSpec((block_rows, lanes), lambda i: (i, 0)),  # dense output slab tile
        compiler_params=pltpu.CompilerParams(
            dimension_semantics=("parallel",),          # megacore split on v7x; no-op on v5e/v6e
            vmem_limit_bytes=32 * 1024 * 1024,          # headroom over v5e's 16 MiB scoped default
        ),
        cost_estimate=pl.CostEstimate(
            flops=4 * n, transcendentals=n, bytes_accessed=12 * n,
        ),
    )(w, xs)


def logistic_regression(
    x: jax.Array,
    weights: jax.Array,
    *,
    block_rows: int = 512,   # 512 x 1024 f32 = 2 MiB per feature slab tile (4 MiB in, 2 MiB out)
    lanes: int = 1024,       # lane width of the dense slab (multiple of 128)
) -> jax.Array:
    """Pallas equivalent of torch.sigmoid(x @ weights) for x of shape (N, 2)."""
    n, f = x.shape
    assert f == 2 and weights.shape == (f,)
    w = weights.astype(jnp.float32)

    # Slab sizing: rows needed at `lanes` per row, sublane-dense (multiple of 8),
    # then padded to a whole number of blocks; block rows adapt down for small N.
    m = max(pl.cdiv(pl.cdiv(n, lanes), 8) * 8, 8)
    r = min(block_rows, m)                 # both multiples of 8
    m = pl.cdiv(m, r) * r
    n_pad = m * lanes

    # Single layout pass: (N, 2) -> dense per-feature slabs (2, M, LANES).
    # Padded tail elements are zeros -> sigmoid(0)=0.5, sliced off below.
    # Producers that already keep activations in this slab layout can call
    # _lr_pallas_slab directly and skip this pass (it is the only extra HBM
    # traffic left in the pipeline).
    xs = jnp.zeros((f, n_pad), dtype=jnp.float32).at[:, :n].set(x.astype(jnp.float32).T)
    xs = xs.reshape(f, m, lanes)

    out = _lr_pallas_slab(xs, w, r)        # (M, LANES) dense slab
    return out.reshape(-1)[:n]


if __name__ == "__main__":
    key = jax.random.PRNGKey(0)
    kx, kw = jax.random.split(key)

    # 2-feature logistic regression; N chosen non-multiple of the slab width to
    # exercise the padded tail (small shape -> single grid step, adaptive block).
    n = 5003
    x = jax.random.normal(kx, (n, 2), dtype=jnp.float32)
    weights = jax.random.normal(kw, (2,), dtype=jnp.float32)     # ~ torch.randn(2)

    y = logistic_regression(x, weights)
    jax.block_until_ready(y)

    ref = jax.nn.sigmoid(x @ weights)
    assert y.shape == (n,)
    assert jnp.allclose(y, ref, atol=1e-6), (y, ref)

    print("KERNEL_OK")
</pallas_src>

<mosaic_0001>
module attributes {stable_mosaic.version = 11 : i64} {
  func.func @_lr_kernel(%arg0: i32, %arg1: memref<2xf32, #tpu.memory_space<smem>>, %arg2: memref<2x8x1024xf32, #tpu.memory_space<vmem>>, %arg3: memref<8x1024xf32, #tpu.memory_space<vmem>>) attributes {dimension_semantics = [#tpu.dimension_semantics<parallel>], iteration_bounds = array<i64: 1>, scalar_prefetch = 0 : i64, scratch_operands = 0 : i64, tpu.core_type = #tpu.core_type<tc>, window_params = [{transform_indices = @transform_0, window_bounds = array<i64: 2>}, {transform_indices = @transform_1, window_bounds = array<i64: 2, 8, 1024>}, {transform_indices = @transform_2, window_bounds = array<i64: 8, 1024>}]} {
    %c0 = arith.constant 0 : index
    %0 = memref.load %arg1[%c0] : memref<2xf32, #tpu.memory_space<smem>>
    %c0_0 = arith.constant 0 : index
    %c0_1 = arith.constant 0 : index
    %c0_2 = arith.constant 0 : index
    %1 = vector.load %arg2[%c0_0, %c0_1, %c0_2] : memref<2x8x1024xf32, #tpu.memory_space<vmem>>, vector<1x8x1024xf32>
    %2 = vector.shape_cast %1 : vector<1x8x1024xf32> to vector<8x1024xf32>
    %3 = vector.broadcast %0 : f32 to vector<8x1024xf32>
    %4 = arith.mulf %3, %2 : vector<8x1024xf32>
    %c1 = arith.constant 1 : index
    %5 = memref.load %arg1[%c1] : memref<2xf32, #tpu.memory_space<smem>>
    %c1_3 = arith.constant 1 : index
    %c0_4 = arith.constant 0 : index
    %c0_5 = arith.constant 0 : index
    %6 = vector.load %arg2[%c1_3, %c0_4, %c0_5] : memref<2x8x1024xf32, #tpu.memory_space<vmem>>, vector<1x8x1024xf32>
    %7 = vector.shape_cast %6 : vector<1x8x1024xf32> to vector<8x1024xf32>
    %8 = vector.broadcast %5 : f32 to vector<8x1024xf32>
    %9 = arith.mulf %8, %7 : vector<8x1024xf32>
    %10 = arith.addf %4, %9 : vector<8x1024xf32>
    %cst = arith.constant 0.000000e+00 : f32
    %11 = vector.broadcast %cst : f32 to vector<8x1024xf32>
    %12 = arith.subf %11, %10 : vector<8x1024xf32>
    %13 = math.exp %12 : vector<8x1024xf32>
    %cst_6 = arith.constant 1.000000e+00 : f32
    %14 = vector.broadcast %cst_6 : f32 to vector<8x1024xf32>
    %15 = arith.addf %14, %13 : vector<8x1024xf32>
    %cst_7 = arith.constant 1.000000e+00 : f32
    %16 = vector.broadcast %cst_7 : f32 to vector<8x1024xf32>
    %17 = arith.divf %16, %15 : vector<8x1024xf32>
    %c0_8 = arith.constant 0 : index
    %c0_9 = arith.constant 0 : index
    %18 = vector.load %arg3[%c0_8, %c0_9] : memref<8x1024xf32, #tpu.memory_space<vmem>>, vector<8x1024xf32>
    tpu.vector_store %arg3[%c0_8, %c0_9], %17 {strides = array<i32>} : memref<8x1024xf32, #tpu.memory_space<vmem>>, vector<8x1024xf32>,
    return
  }
  func.func @transform_0(%arg0: i32) -> i32 {
    %c0_i32 = arith.constant 0 : i32
    %c0_i32_0 = arith.constant 0 : i32
    return %c0_i32 : i32
  }
  func.func @transform_1(%arg0: i32) -> (i32, i32, i32) {
    %c0_i32 = arith.constant 0 : i32
    %c0_i32_0 = arith.constant 0 : i32
    %c0_i32_1 = arith.constant 0 : i32
    return %c0_i32, %arg0, %c0_i32_0 : i32, i32, i32
  }
  func.func @transform_2(%arg0: i32) -> (i32, i32) {
    %c0_i32 = arith.constant 0 : i32
    %c0_i32_0 = arith.constant 0 : i32
    return %arg0, %c0_i32 : i32, i32
  }
}

</mosaic_0001>

<bundles_post_ra>
// kernel: tpu_custom_call.1
= control target key start
LH: loop header
LB: loop body
LE: loop exit
PB: predicated region body
PF: predicated region fallthrough
CT: control target
= control target key end

     0   :  { %7 = vsyncpa [#allocation5], 0  ;;  %s509_s0 = inlined_call_operand.hbm [shape: f32[2], index: 0, kind: input, shape index: {}]   ;;  %s510_s1 = inlined_call_operand.hbm [shape: f32[2,8,1024], index: 1, kind: input, shape index: {}]   ;;  %s511_s2 = inlined_call_operand.hbm [shape: f32[8,1024], index: 2, kind: output, shape index: {}]  }
   0x1   :  { %8 = vsyncpa [#allocation3], 0 }
   0x2   :  { %9 = vsyncpa [#allocation4], 0  ;;  %s15_s11 = sshll.u32 %s509_s0, 4  ;;  %s23_s14 = sshll.u32 %s510_s1, 4  ;;  %s16_s11 = int_to_ptr.hbm [resolvable:$true] %s15_s11  ;;  %s24_s14 = int_to_ptr.hbm [resolvable:$true] %s23_s14 }
   0x3   :  { %s368_s15 = smov [#allocation2]   ;;  %s369_s16 = smov [#allocation6]  }
   0x4   :  { %18 = dma.hbm_to_smem %s16_s11, 16, %s368_s15, [#allocation5]  }
   0x5   :  { %s25_s17 = sshll.u32 %s369_s16, 4  ;;  %s370_s18 = smov 1024   ;;  %s26_s17 = int_to_ptr.vmem [resolvable:$true] %s25_s17 }
   0x6   :  { %s371_s19 = smov 64  }
   0x7   :  { %31 = dma.hbm_to_vmem [thread:$0]  %s24_s14, 2048, %s26_s17, [#allocation3], %s370_s18, %s370_s18, %s371_s19  }
   0x8   :  { %362 = dma.done.wait [#allocation5], 16  }
   0x9   :  { %363 = vsyncadd [#allocation5], 4294967280 }
   0xa   :  { %364 = dma.done.wait [#allocation3], 2048  }
   0xb   :  { %365 = vsyncadd [#allocation3], 4294965248 }
   0xc   :  { %40 = sfence }
   0xd   :  { %s41_s0 = sld [smem:[#allocation2]]  ;;  %v42_v0 = vld [vmem:[#allocation6] sm:$0xff]  ;;  %v43_v2 = vld [vmem:[#allocation6 + $0x8] sm:$0xff]  ;;  %v44_v4 = vld [vmem:[#allocation6 + $0x10] sm:$0xff]  ;;  %s372_s1 = smov [#allocation7]  }
   0xe   :  { %s264_s20 = sld [smem:[#allocation2 + $0x1]]  ;;  %v61_v1 = vld [vmem:[#allocation6 + $0x40] sm:$0xff]  ;;  %v62_v3 = vld [vmem:[#allocation6 + $0x48] sm:$0xff]  ;;  %v63_v5 = vld [vmem:[#allocation6 + $0x50] sm:$0xff]  ;;  %s251_s21 = sshll.u32 %s372_s1, 4  ;;  %s252_s21 = int_to_ptr.vmem [resolvable:$true] %s251_s21 }
   0xf   :  { %v45_v6 = vld [vmem:[#allocation6 + $0x18] sm:$0xff]  ;;  %v46_v9 = vld [vmem:[#allocation6 + $0x20] sm:$0xff]  ;;  %v47_v11 = vld [vmem:[#allocation6 + $0x28] sm:$0xff]  ;;  %s253_s24 = sshll.u32 %s511_s2, 4  ;;  %s254_s24 = int_to_ptr.hbm [resolvable:$true] %s253_s24 }
  0x10   :  { %v64_v7 = vld [vmem:[#allocation6 + $0x58] sm:$0xff]  ;;  %v65_v10 = vld [vmem:[#allocation6 + $0x60] sm:$0xff]  ;;  %v66_v16 = vld [vmem:[#allocation6 + $0x68] sm:$0xff] }
  0x11   :  { %v48_v21 = vld [vmem:[#allocation6 + $0x30] sm:$0xff]  ;;  %v49_v31 = vld [vmem:[#allocation6 + $0x38] sm:$0xff] }
  0x12   :  { %v67_v22 = vld [vmem:[#allocation6 + $0x70] sm:$0xff]  ;;  %v68_v36 = vld [vmem:[#allocation6 + $0x78] sm:$0xff] }
  0x13   :  { %v50_v8 = vstv %s41_s0 }
  0x14   :  { %v51_v12 = vmul.f32 %v50_v8, %v42_v0  ;;  %v69_v13 = vstv %s264_s20  ;;  %v52_v14 = vmul.f32 %v50_v8, %v43_v2  ;;  %v53_v15 = vmul.f32 %v50_v8, %v44_v4 }
  0x15   :  { %v70_v17 = vmul.f32 %v69_v13, %v61_v1  ;;  %v71_v18 = vmul.f32 %v69_v13, %v62_v3  ;;  %v72_v19 = vmul.f32 %v69_v13, %v63_v5  ;;  %v54_v20 = vmul.f32 %v50_v8, %v45_v6 }
  0x16   :  { %v73_v23 = vmul.f32 %v69_v13, %v64_v7  ;;  %v55_v24 = vmul.f32 %v50_v8, %v46_v9  ;;  %v74_v25 = vmul.f32 %v69_v13, %v65_v10  ;;  %v56_v26 = vmul.f32 %v50_v8, %v47_v11 }
  0x17   :  { %v78_v27 = vadd.f32 %v70_v17, %v51_v12  ;;  %v79_v28 = vadd.f32 %v71_v18, %v52_v14  ;;  %v80_v29 = vadd.f32 %v72_v19, %v53_v15  ;;  %v75_v30 = vmul.f32 %v69_v13, %v66_v16 }
  0x18   :  { %v81_v32 = vadd.f32 %v73_v23, %v54_v20  ;;  %v82_v33 = vadd.f32 %v74_v25, %v55_v24  ;;  %v57_v34 = vmul.f32 %v50_v8, %v48_v21  ;;  %v76_v35 = vmul.f32 %v69_v13, %v67_v22 }
  0x19   :  { %v86_v37 = vsub.f32 0.0, %v78_v27  ;;  %v87_v38 = vsub.f32 0.0, %v79_v28  ;;  %v88_v39 = vsub.f32 0.0, %v80_v29  ;;  %v83_v40 = vadd.f32 %v75_v30, %v56_v26 }
  0x1a   :  { %v89_v41 = vsub.f32 0.0, %v81_v32  ;;  %v90_v42 = vsub.f32 0.0, %v82_v33  ;;  %v58_v43 = vmul.f32 %v50_v8, %v49_v31  ;;  %v77_v47 = vmul.f32 %v69_v13, %v68_v36 }
  0x1b   :  { %v94_v44 = vmul.f32 1.442695, %v86_v37  ;;  %v96_v45 = vmul.f32 1.442695, %v87_v38  ;;  %v98_v46 = vmul.f32 1.442695, %v88_v39  ;;  %v84_v50 = vadd.f32 %v76_v35, %v57_v34 }
  0x1c   :  { %v100_v48 = vmul.f32 1.442695, %v89_v41  ;;  %v91_v49 = vsub.f32 0.0, %v83_v40  ;;  %v102_v51 = vmul.f32 1.442695, %v90_v42  ;;  %v85_v52 = vadd.f32 %v77_v47, %v58_v43 }
  0x1d   :  { %270 = vpow2.f32 %v94_v44  ;;  %v92_v54 = vsub.f32 0.0, %v84_v50 }
  0x1e   :  { %272 = vpow2.f32 %v96_v45  ;;  %v104_v53 = vmul.f32 1.442695, %v91_v49  ;;  %v93_v55 = vsub.f32 0.0, %v85_v52 }
  0x1f   :  { %274 = vpow2.f32 %v98_v46  ;;  %v106_v59 = vmul.f32 1.442695, %v92_v54 }
  0x20   :  { %276 = vpow2.f32 %v100_v48  ;;  %v108_v62 = vmul.f32 1.442695, %v93_v55 }
  0x21   :  { %278 = vpow2.f32 %v102_v51 }
  0x22   :  { %280 = vpow2.f32 %v104_v53 }
  0x23   :  { %v271_v56 = vpop.eup %270 }
  0x24   :  { %v273_v57 = vpop.eup %272  ;;  %v110_v58 = vadd.f32 1.0, %v271_v56 }
  0x25   :  { %v275_v60 = vpop.eup %274  ;;  %v394_v61 = vadd.f32 1.0, %v273_v57 }
  0x26   :  { %v277_v63 = vpop.eup %276  ;;  %282 = vrcp.f32 %v110_v58  ;;  %v127_v1 = vand.u32 2147483647, %v110_v58  ;;  %v129_v3 = vand.u32 2147483648, %v110_v58  ;;  %v397_v4 = vadd.f32 1.0, %v275_v60 }
  0x27   :  { %v279_v0 = vpop.eup %278  ;;  %284 = vrcp.f32 %v394_v61  ;;  %v399_v5 = vadd.f32 1.0, %v277_v63  ;;  %v142_v6 = vand.u32 2147483647, %v394_v61  ;;  %v144_v7 = vand.u32 2147483648, %v394_v61 }
  0x28   :  { %v281_v2 = vpop.eup %280  ;;  %286 = vpow2.f32 %v106_v59  ;;  %v403_v8 = vadd.f32 1.0, %v279_v0  ;;  %vm123_vm0 = vweird.f32 %v110_v58  ;;  %vm138_vm1 = vweird.f32 %v394_v61 }
  0x29   :  { %288 = vpow2.f32 %v108_v62  ;;  %v159_v9 = vand.u32 2147483648, %v397_v4  ;;  %vm408_vm2 = vcmp.eq.f32.partialorder %v127_v1, 8.507059e+37  ;;  %v157_v11 = vand.u32 2147483647, %v397_v4 }
  0x2a   :  { %290 = vrcp.f32 %v397_v4  ;;  %v414_v12 = vadd.f32 1.0, %v281_v2  ;;  %v130_v14 = vor.u32 1.1754944e-38, %v129_v3  ;;  %v172_v15 = vand.u32 2147483647, %v399_v5 }
  0x2b   :  { %292 = vrcp.f32 %v399_v5  ;;  %v174_v16 = vand.u32 2147483648, %v399_v5  ;;  %vm419_vm3 = vcmp.eq.f32.partialorder %v142_v6, 8.507059e+37  ;;  %v145_v20 = vor.u32 1.1754944e-38, %v144_v7 }
  0x2c   :  { %v283_v13 = vpop.eup %282  ;;  %294 = vrcp.f32 %v403_v8  ;;  %vm153_vm4 = vweird.f32 %v397_v4  ;;  %v160_v23 = vor.u32 1.1754944e-38, %v159_v9  ;;  %vm168_vm5 = vweird.f32 %v399_v5 }
  0x2d   :  { %v285_v17 = vpop.eup %284  ;;  %v119_v18 = vmul.f32 %v283_v13, %v110_v58  ;;  %v189_v24 = vand.u32 2147483648, %v403_v8  ;;  %vm124_vm6 = vweird.f32 %v283_v13  ;;  %vm427_vm7 = vcmp.eq.f32.partialorder %v157_v11, 8.507059e+37 }
  0x2e   :  { %v287_v21 = vpop.eup %286  ;;  %v134_v22 = vmul.f32 %v285_v17, %v394_v61  ;;  %vm183_vm8 = vweird.f32 %v403_v8  ;;  %296 = vrcp.f32 %v414_v12  ;;  %vm139_vm9 = vweird.f32 %v285_v17  ;;  %vm443_vm12 = vmor %vm123_vm0, %vm124_vm6 }
  0x2f   :  { %v289_v25 = vpop.eup %288  ;;  %v120_v26 = vsub.f32 1.0, %v119_v18  ;;  %vm433_vm10 = vcmp.eq.f32.partialorder %v172_v15, 8.507059e+37  ;;  %v175_v31 = vor.u32 1.1754944e-38, %v174_v16  ;;  %v187_v32 = vand.u32 2147483647, %v403_v8  ;;  %vm451_vm14 = vmor %vm138_vm1, %vm139_vm9 }
  0x30   :  { %v291_v28 = vpop.eup %290  ;;  %v135_v29 = vsub.f32 1.0, %v134_v22  ;;  %vm198_vm11 = vweird.f32 %v414_v12  ;;  %v202_v36 = vand.u32 2147483647, %v414_v12  ;;  %v190_v41 = vor.u32 1.1754944e-38, %v189_v24 }
  0x31   :  { %v293_v33 = vpop.eup %292  ;;  %v121_v34 = vmul.f32 %v283_v13, %v120_v26  ;;  %v149_v35 = vmul.f32 %v291_v28, %v397_v4  ;;  %vm154_vm13 = vweird.f32 %v291_v28  ;;  %v116_v48 = vadd.f32 1.0, %v287_v21 }
  0x32   :  { %v295_v37 = vpop.eup %294  ;;  %v136_v39 = vmul.f32 %v285_v17, %v135_v29  ;;  %v164_v40 = vmul.f32 %v293_v33, %v399_v5  ;;  %vm169_vm15 = vweird.f32 %v293_v33  ;;  %v458_v53 = vadd.f32 1.0, %v289_v25  ;;  %vm467_vm1 = vmor %vm153_vm4, %vm154_vm13 }
  0x33   :  { %v122_v42 = vadd.f32 %v283_v13, %v121_v34  ;;  %v150_v44 = vsub.f32 1.0, %v149_v35  ;;  %v179_v45 = vmul.f32 %v295_v37, %v403_v8  ;;  %vm184_vm0 = vweird.f32 %v295_v37 }
  0x34   :  { %v137_v46 = vadd.f32 %v285_v17, %v136_v39  ;;  %v165_v47 = vsub.f32 1.0, %v164_v40  ;;  %v297_v49 = vpop.eup %296  ;;  %v204_v63 = vand.u32 2147483648, %v414_v12  ;;  %vm485_vm4 = vmor %vm183_vm8, %vm184_vm0  ;;  %298 = vrcp.f32 %v116_v48 }
  0x35   :  { %v126_v50 = vsel %vm443_vm12, %v283_v13, %v122_v42  ;;  %v151_v51 = vmul.f32 %v291_v28, %v150_v44  ;;  %v180_v52 = vsub.f32 1.0, %v179_v45  ;;  %v194_v58 = vmul.f32 %v297_v49, %v414_v12 }
  0x36   :  { %v131_v54 = vsel %vm408_vm2, %v130_v14, %v126_v50  ;;  %v141_v55 = vsel %vm451_vm14, %v285_v17, %v137_v46  ;;  %v166_v57 = vmul.f32 %v293_v33, %v165_v47  ;;  %vm477_vm2 = vmor %vm168_vm5, %vm169_vm15  ;;  %vm188_vm5 = vcmp.eq.f32.partialorder %v187_v32, 8.507059e+37 }
  0x37   :  { %238 = vst [vmem:[#allocation7] sm:$0xff] %v131_v54  ;;  %v146_v59 = vsel %vm419_vm3, %v145_v20, %v141_v55  ;;  %v152_v60 = vadd.f32 %v291_v28, %v151_v51  ;;  %v181_v62 = vmul.f32 %v295_v37, %v180_v52  ;;  %v195_v2 = vsub.f32 1.0, %v194_v58 }
  0x38   :  { %239 = vst [vmem:[#allocation7 + $0x8] sm:$0xff] %v146_v59  ;;  %v167_v0 = vadd.f32 %v293_v33, %v166_v57  ;;  %vm199_vm3 = vweird.f32 %v297_v49  ;;  %300 = vrcp.f32 %v458_v53  ;;  %v205_v10 = vor.u32 1.1754944e-38, %v204_v63 }
  0x39   :  { %v156_v3 = vsel %vm467_vm1, %v291_v28, %v152_v60  ;;  %v182_v4 = vadd.f32 %v295_v37, %v181_v62  ;;  %v196_v7 = vmul.f32 %v297_v49, %v195_v2  ;;  %vm200_vm6 = vmor %vm198_vm11, %vm199_vm3  ;;  %vm213_vm8 = vweird.f32 %v116_v48 }
  0x3a   :  { %v161_v5 = vsel %vm427_vm7, %v160_v23, %v156_v3  ;;  %v171_v6 = vsel %vm477_vm2, %v293_v33, %v167_v0  ;;  %vm203_vm7 = vcmp.eq.f32.partialorder %v202_v36, 8.507059e+37  ;;  %v299_v14 = vpop.eup %298  ;;  %v219_v19 = vand.u32 2147483648, %v116_v48 }
  0x3b   :  { %240 = vst [vmem:[#allocation7 + $0x10] sm:$0xff] %v161_v5  ;;  %v176_v8 = vsel %vm433_vm10, %v175_v31, %v171_v6  ;;  %v186_v9 = vsel %vm485_vm4, %v295_v37, %v182_v4  ;;  %v197_v13 = vadd.f32 %v297_v49, %v196_v7  ;;  %v209_v17 = vmul.f32 %v299_v14, %v116_v48 }
  0x3c   :  { %241 = vst [vmem:[#allocation7 + $0x18] sm:$0xff] %v176_v8  ;;  %v191_v11 = vsel %vm188_vm5, %v190_v41, %v186_v9  ;;  %vm214_vm9 = vweird.f32 %v299_v14  ;;  %v217_v21 = vand.u32 2147483647, %v116_v48  ;;  %vm228_vm10 = vweird.f32 %v458_v53 }
  0x3d   :  { %242 = vst [vmem:[#allocation7 + $0x20] sm:$0xff] %v191_v11  ;;  %v201_v15 = vsel %vm200_vm6, %v297_v49, %v197_v13  ;;  %v210_v20 = vsub.f32 1.0, %v209_v17  ;;  %v234_v22 = vand.u32 2147483648, %v458_v53  ;;  %v232_v25 = vand.u32 2147483647, %v458_v53  ;;  %vm215_vm12 = vmor %vm213_vm8, %vm214_vm9 }
  0x3e   :  { %v206_v16 = vsel %vm203_vm7, %v205_v10, %v201_v15  ;;  %v301_v18 = vpop.eup %300  ;;  %v220_v26 = vor.u32 1.1754944e-38, %v219_v19  ;;  %vm218_vm13 = vcmp.eq.f32.partialorder %v217_v21, 8.507059e+37 }
  0x3f   :  { %243 = vst [vmem:[#allocation7 + $0x28] sm:$0xff] %v206_v16  ;;  %v224_v12 = vmul.f32 %v301_v18, %v458_v53  ;;  %v211_v23 = vmul.f32 %v299_v14, %v210_v20  ;;  %vm229_vm11 = vweird.f32 %v301_v18  ;;  %v235_v29 = vor.u32 1.1754944e-38, %v234_v22 }
  0x40   :  { %vm230_vm14 = vmor %vm228_vm10, %vm229_vm11  ;;  %vm233_vm15 = vcmp.eq.f32.partialorder %v232_v25, 8.507059e+37 }
  0x41   :  { %v225_v24 = vsub.f32 1.0, %v224_v12  ;;  %v212_v27 = vadd.f32 %v299_v14, %v211_v23 }
  0x43   :  { %v226_v28 = vmul.f32 %v301_v18, %v225_v24  ;;  %v216_v30 = vsel %vm215_vm12, %v299_v14, %v212_v27 }
  0x44   :  { %v221_v32 = vsel %vm218_vm13, %v220_v26, %v216_v30 }
  0x45   :  { %v227_v31 = vadd.f32 %v301_v18, %v226_v28  ;;  %244 = vst [vmem:[#allocation7 + $0x30] sm:$0xff] %v221_v32 }
  0x47   :  { %v231_v33 = vsel %vm230_vm14, %v301_v18, %v227_v31 }
  0x48   :  { %v236_v34 = vsel %vm233_vm15, %v235_v29, %v231_v33 }
  0x49   :  { %245 = vst [vmem:[#allocation7 + $0x38] sm:$0xff] %v236_v34 }
  0x4a   :  { %256 = dma.vmem_to_hbm [thread:$0]  %s252_s21, 1024, %s254_s24, [#allocation4]  }
  0x4b   :  { %366 = dma.done.wait [#allocation4], 1024  }
  0x4c   :  { %367 = vsyncadd [#allocation4], 4294966272 }
  0x4d   :  { %261 = vsyncpa [#allocation3], 1 }
  0x4e   :  { %262 = vsyncpa [#allocation4], 1 }
  0x4f   :  { %263 = vsyncpa [#allocation5], 1 }

</bundles_post_ra>
